<compile_context>
chip_gen: v5e
topology: v5e:2x2
jax: 0.10.0
libtpu: 0.0.40
codegen_flags: <defaults>
</compile_context>

<pallas_src>
import jax
import jax.numpy as jnp
from jax import lax
from jax.experimental import pallas as pl
from jax.experimental.pallas import tpu as pltpu

EPS = 1e-5  # PyTorch BatchNorm1d default


def _mass_centre_kernel(x_ref, wenc_ref, slab_ref, out_ref):
    # --- encoder final projection, fused in (biggest wall-clock win) ---------
    x = x_ref[...].astype(jnp.float32)                                   # (B, IN)
    f = jnp.dot(x, wenc_ref[...], preferred_element_type=jnp.float32)    # (B, L)

    L = wenc_ref.shape[1]
    H2 = slab_ref.shape[1]            # = 2 * hidden

    # --- BatchNorm1d(L), training-mode batch stats, shared by both heads -----
    d1 = f - jnp.mean(f, axis=0, keepdims=True)                          # centred once
    z1 = d1 * lax.rsqrt(jnp.mean(d1 * d1, axis=0, keepdims=True) + EPS)  # (B, L)

    # --- both heads' Linear(L, H) as one (L, 2H) matmul (BN1 affine folded) --
    # The fused bias b1f is a per-column constant -> exactly cancelled by the
    # BN2 mean subtraction below, so it is not added at all.
    h = jnp.dot(z1, slab_ref[0:L, :], preferred_element_type=jnp.float32)  # (B, 2H)

    # --- BatchNorm1d(H) for both heads at once --------------------------------
    d2 = h - jnp.mean(h, axis=0, keepdims=True)
    z2 = d2 * lax.rsqrt(jnp.mean(d2 * d2, axis=0, keepdims=True) + EPS)   # (B, 2H)

    # --- block-diagonal Linear(2H, 2) (BN2 affine folded) + bias --------------
    w2 = slab_ref[L:L + H2, 0:2]                                          # (2H, 2)
    b2 = slab_ref[L + H2:L + H2 + 1, 0:2]                                 # (1, 2)
    out = jnp.dot(z2, w2, preferred_element_type=jnp.float32) + b2        # (B, 2)
    out_ref[...] = out.astype(out_ref.dtype)


def pack_entity_mass_centre_params(params):
    """Folds BN affines into the Linears, fuses the two heads, and packs
    everything into ONE parameter slab (runs once on the host)."""
    g1, w1 = params["g1"], params["w1"]
    g2, be2, w2, b2 = params["g2"], params["be2"], params["w2"], params["b2"]
    _, L, H = w1.shape
    f32 = jnp.float32

    # BN1 affine (gamma) folded into Linear(L, H); heads concatenated -> (L, 2H).
    # (BN1 beta + Linear bias are cancelled by BN2's mean subtraction -> dropped.)
    w1f = jnp.concatenate(
        [g1[h][:, None] * w1[h] for h in range(2)], axis=1).astype(f32)     # (L, 2H)

    # BN2 affine folded into Linear(H, 1); block-diagonal over the two heads.
    w2bd = jnp.zeros((2 * H, 2), f32)
    w2bd = w2bd.at[:H, 0].set(w2[0][:, 0]).at[H:, 1].set(w2[1][:, 0])       # (2H, 2)
    g2f = jnp.concatenate([g2[0], g2[1]], axis=0)                            # (2H,)
    be2f = jnp.concatenate([be2[0], be2[1]], axis=0)                         # (2H,)
    w2e = (g2f[:, None] * w2bd).astype(f32)                                  # (2H, 2)
    b2e = (be2f @ w2bd + b2[:, 0]).astype(f32)                               # (2,)

    # Single slab: rows [0,L) = w1f, rows [L,L+2H) = w2e (lanes 0..1),
    # last row = b2e (lanes 0..1).  One input DMA instead of three.
    slab = jnp.zeros((L + 2 * H + 1, 2 * H), f32)
    slab = slab.at[:L, :].set(w1f)
    slab = slab.at[L:L + 2 * H, :2].set(w2e)
    slab = slab.at[L + 2 * H, :2].set(b2e)
    return slab


def entity_mass_centre_forward(x, w_enc, slab):
    """Fused encoder-projection + both classifier heads -> (B, 2)."""
    B = x.shape[0]
    x_flat = x.reshape(B, -1).astype(jnp.float32)      # free reshape, stays in HBM
    vmem = pl.BlockSpec(memory_space=pltpu.MemorySpace.VMEM)
    # Whole problem is a few KiB -> single grid-less VMEM-resident invocation.
    # TODO(synk): if this head is called per-entity / per-step, batch the calls
    # behind a leading "parallel" grid axis (unlocks the 2nd TC on v7x).
    return pl.pallas_call(
        _mass_centre_kernel,
        out_shape=jax.ShapeDtypeStruct((B, 2), jnp.float32),
        in_specs=[vmem, vmem, vmem],
        out_specs=vmem,
    )(x_flat, w_enc, slab)


if __name__ == "__main__":
    key = jax.random.PRNGKey(0)
    k = jax.random.split(key, 10)

    # Small shapes consistent with the module.
    B, C, IMG_H, IMG_W = 8, 1, 16, 16      # entity image, expand_dims -> channel=1 (NCHW)
    LATENT, HIDDEN = 32, 16                # latent_space_size, hidden_layer_size
    IN = C * IMG_H * IMG_W

    x = jax.random.normal(k[0], (B, C, IMG_H, IMG_W), jnp.float32)

    # TODO(synk): the real `encoder` is an external nn.Module handed in at call
    # time; here its final projection is stubbed as a single matmul and FUSED
    # into the Pallas kernel per the review.  Any earlier encoder layers would
    # remain outside this pallas_call.
    w_enc = jax.random.normal(k[1], (IN, LATENT), jnp.float32) * 0.05

    def lin_init(kk, fan_in, shape):
        bound = 1.0 / float(fan_in) ** 0.5
        return jax.random.uniform(kk, shape, jnp.float32, -bound, bound)

    # Non-trivial BN gammas/betas so the host-side folding is actually exercised.
    params = dict(
        g1=1.0 + 0.1 * jax.random.normal(k[6], (2, LATENT), jnp.float32),
        be1=0.1 * jax.random.normal(k[7], (2, LATENT), jnp.float32),
        w1=lin_init(k[2], LATENT, (2, LATENT, HIDDEN)),
        b1=lin_init(k[3], LATENT, (2, HIDDEN)),
        g2=1.0 + 0.1 * jax.random.normal(k[8], (2, HIDDEN), jnp.float32),
        be2=0.1 * jax.random.normal(k[9], (2, HIDDEN), jnp.float32),
        w2=lin_init(k[4], HIDDEN, (2, HIDDEN, 1)),
        b2=lin_init(k[5], HIDDEN, (2, 1)),
    )

    slab = pack_entity_mass_centre_params(params)        # once, off the hot path
    out = entity_mass_centre_forward(x, w_enc, slab)
    out = jax.block_until_ready(out)
    assert out.shape == (B, 2)

    # Pure-JAX reference: the ORIGINAL per-head, un-fused module math
    # (including the biases / BN betas that the kernel proves are cancelled).
    feat = x.reshape(B, -1) @ w_enc                      # encoder(x)[0], flattened

    def ref_head(f, h):
        mu = f.mean(0, keepdims=True)
        var = ((f - mu) ** 2).mean(0, keepdims=True)
        z = (f - mu) / jnp.sqrt(var + EPS) * params["g1"][h] + params["be1"][h]
        z = z @ params["w1"][h] + params["b1"][h]
        mu2 = z.mean(0, keepdims=True)
        var2 = ((z - mu2) ** 2).mean(0, keepdims=True)
        z = (z - mu2) / jnp.sqrt(var2 + EPS) * params["g2"][h] + params["be2"][h]
        return z @ params["w2"][h] + params["b2"][h]

    ref = jnp.concatenate([ref_head(feat, 0), ref_head(feat, 1)], axis=1)
    assert jnp.allclose(out, ref, atol=1e-4, rtol=1e-4), (out, ref)

    print("KERNEL_OK")
</pallas_src>

<mosaic_0001>
module attributes {stable_mosaic.version = 11 : i64} {
  func.func @_mass_centre_kernel(%arg0: memref<8x256xf32, #tpu.memory_space<vmem>>, %arg1: memref<256x32xf32, #tpu.memory_space<vmem>>, %arg2: memref<65x32xf32, #tpu.memory_space<vmem>>, %arg3: memref<8x2xf32, #tpu.memory_space<vmem>>) attributes {dimension_semantics = [], scalar_prefetch = 0 : i64, scratch_operands = 0 : i64, tpu.core_type = #tpu.core_type<tc>} {
    %c0 = arith.constant 0 : index
    %c0_0 = arith.constant 0 : index
    %0 = vector.load %arg0[%c0, %c0_0] : memref<8x256xf32, #tpu.memory_space<vmem>>, vector<8x256xf32>
    %c0_1 = arith.constant 0 : index
    %c0_2 = arith.constant 0 : index
    %1 = vector.load %arg1[%c0_1, %c0_2] : memref<256x32xf32, #tpu.memory_space<vmem>>, vector<256x32xf32>
    %cst = arith.constant dense<0.000000e+00> : vector<8x32xf32>
    %2 = tpu.matmul %0, %1, %cst {dimension_numbers = #tpu.dot_dimension_numbers<[1], [0], [0], [1], [0, 0, 1, 1], [], []>} : vector<8x256xf32>, vector<256x32xf32>, vector<8x32xf32> -> vector<8x32xf32>
    %cst_3 = arith.constant dense<0.000000e+00> : vector<32xf32>
    %3 = vector.multi_reduction <add>, %2, %cst_3 [0] : vector<8x32xf32> to vector<32xf32>
    %4 = vector.shape_cast %3 : vector<32xf32> to vector<1x32xf32>
    %cst_4 = arith.constant 8.000000e+00 : f32
    %5 = vector.broadcast %cst_4 : f32 to vector<1x32xf32>
    %6 = arith.divf %4, %5 : vector<1x32xf32>
    %7 = vector.broadcast %6 : vector<1x32xf32> to vector<8x32xf32>
    %8 = arith.subf %2, %7 : vector<8x32xf32>
    %9 = arith.mulf %8, %8 : vector<8x32xf32>
    %cst_5 = arith.constant dense<0.000000e+00> : vector<32xf32>
    %10 = vector.multi_reduction <add>, %9, %cst_5 [0] : vector<8x32xf32> to vector<32xf32>
    %11 = vector.shape_cast %10 : vector<32xf32> to vector<1x32xf32>
    %cst_6 = arith.constant 8.000000e+00 : f32
    %12 = vector.broadcast %cst_6 : f32 to vector<1x32xf32>
    %13 = arith.divf %11, %12 : vector<1x32xf32>
    %cst_7 = arith.constant 9.99999974E-6 : f32
    %14 = vector.broadcast %cst_7 : f32 to vector<1x32xf32>
    %15 = arith.addf %13, %14 : vector<1x32xf32>
    %16 = math.rsqrt %15 : vector<1x32xf32>
    %17 = vector.broadcast %16 : vector<1x32xf32> to vector<8x32xf32>
    %18 = arith.mulf %8, %17 : vector<8x32xf32>
    %c0_8 = arith.constant 0 : index
    %c0_9 = arith.constant 0 : index
    %19 = vector.load %arg2[%c0_8, %c0_9] : memref<65x32xf32, #tpu.memory_space<vmem>>, vector<32x32xf32>
    %cst_10 = arith.constant dense<0.000000e+00> : vector<8x32xf32>
    %20 = tpu.matmul %18, %19, %cst_10 {dimension_numbers = #tpu.dot_dimension_numbers<[1], [0], [0], [1], [0, 0, 1, 1], [], []>} : vector<8x32xf32>, vector<32x32xf32>, vector<8x32xf32> -> vector<8x32xf32>
    %cst_11 = arith.constant dense<0.000000e+00> : vector<32xf32>
    %21 = vector.multi_reduction <add>, %20, %cst_11 [0] : vector<8x32xf32> to vector<32xf32>
    %22 = vector.shape_cast %21 : vector<32xf32> to vector<1x32xf32>
    %cst_12 = arith.constant 8.000000e+00 : f32
    %23 = vector.broadcast %cst_12 : f32 to vector<1x32xf32>
    %24 = arith.divf %22, %23 : vector<1x32xf32>
    %25 = vector.broadcast %24 : vector<1x32xf32> to vector<8x32xf32>
    %26 = arith.subf %20, %25 : vector<8x32xf32>
    %27 = arith.mulf %26, %26 : vector<8x32xf32>
    %cst_13 = arith.constant dense<0.000000e+00> : vector<32xf32>
    %28 = vector.multi_reduction <add>, %27, %cst_13 [0] : vector<8x32xf32> to vector<32xf32>
    %29 = vector.shape_cast %28 : vector<32xf32> to vector<1x32xf32>
    %cst_14 = arith.constant 8.000000e+00 : f32
    %30 = vector.broadcast %cst_14 : f32 to vector<1x32xf32>
    %31 = arith.divf %29, %30 : vector<1x32xf32>
    %cst_15 = arith.constant 9.99999974E-6 : f32
    %32 = vector.broadcast %cst_15 : f32 to vector<1x32xf32>
    %33 = arith.addf %31, %32 : vector<1x32xf32>
    %34 = math.rsqrt %33 : vector<1x32xf32>
    %35 = vector.broadcast %34 : vector<1x32xf32> to vector<8x32xf32>
    %36 = arith.mulf %26, %35 : vector<8x32xf32>
    %c32 = arith.constant 32 : index
    %c0_16 = arith.constant 0 : index
    %37 = vector.load %arg2[%c32, %c0_16] : memref<65x32xf32, #tpu.memory_space<vmem>>, vector<32x2xf32>
    %c64 = arith.constant 64 : index
    %c0_17 = arith.constant 0 : index
    %38 = vector.load %arg2[%c64, %c0_17] : memref<65x32xf32, #tpu.memory_space<vmem>>, vector<1x2xf32>
    %cst_18 = arith.constant dense<0.000000e+00> : vector<8x2xf32>
    %39 = tpu.matmul %36, %37, %cst_18 {dimension_numbers = #tpu.dot_dimension_numbers<[1], [0], [0], [1], [0, 0, 1, 1], [], []>} : vector<8x32xf32>, vector<32x2xf32>, vector<8x2xf32> -> vector<8x2xf32>
    %40 = vector.broadcast %38 : vector<1x2xf32> to vector<8x2xf32>
    %41 = arith.addf %39, %40 : vector<8x2xf32>
    %c0_19 = arith.constant 0 : index
    %c0_20 = arith.constant 0 : index
    %42 = vector.load %arg3[%c0_19, %c0_20] : memref<8x2xf32, #tpu.memory_space<vmem>>, vector<8x2xf32>
    tpu.vector_store %arg3[%c0_19, %c0_20], %41 {strides = array<i32>} : memref<8x2xf32, #tpu.memory_space<vmem>>, vector<8x2xf32>,
    return
  }
}

</mosaic_0001>

<bundles_post_ra>
// kernel: tpu_custom_call.1
= control target key start
LH: loop header
LB: loop body
LE: loop exit
PB: predicated region body
PF: predicated region fallthrough
CT: control target
= control target key end

     0   :  { %v228_v34 = vmov 8.0   ;;  %vm88_vm0 = vcmask 261120   ;;  %vm212_vm8 = vcmask 15360   ;;  %s387_s1 = inlined_call_operand.vmem [shape: f32[256,32], index: 1, kind: input, shape index: {}]   ;;  %s388_s0 = inlined_call_operand.vmem [shape: f32[8,256], index: 0, kind: input, shape index: {}]   ;;  %s389_s2 = inlined_call_operand.vmem [shape: f32[65,32], index: 2, kind: input, shape index: {}]   ;;  %s390_s3 = inlined_call_operand.vmem [shape: f32[8,2], index: 3, kind: output, shape index: {}]  }
   0x1   :  { %v31_v0 = vld [vmem:[%s387_s1 + $0x78] sm:$0xff]  ;;  %v30_v2 = vld [vmem:[%s387_s1 + $0x70] sm:$0xff]  ;;  %v29_v4 = vld [vmem:[%s387_s1 + $0x68] sm:$0xff]  ;;  %222 = vrcp.f32 %v228_v34 }
   0x2   :  { %v47_v1 = vld [vmem:[%s387_s1 + $0xf8] sm:$0xff]  ;;  %48 = vmatpush.msra.mxu0 %v31_v0  ;;  %v46_v3 = vld [vmem:[%s387_s1 + $0xf0] sm:$0xff]  ;;  %v45_v5 = vld [vmem:[%s387_s1 + $0xe8] sm:$0xff] }
   0x3   :  { %68 = vmatpush.msra.mxu1 %v47_v1  ;;  %v28_v6 = vld [vmem:[%s387_s1 + $0x60] sm:$0xff]  ;;  %v27_v8 = vld [vmem:[%s387_s1 + $0x58] sm:$0xff]  ;;  %v26_v10 = vld [vmem:[%s387_s1 + $0x50] sm:$0xff] }
   0x4   :  { %49 = vmatpush.msra.mxu0 %v30_v2  ;;  %v44_v7 = vld [vmem:[%s387_s1 + $0xe0] sm:$0xff]  ;;  %v43_v9 = vld [vmem:[%s387_s1 + $0xd8] sm:$0xff]  ;;  %v42_v11 = vld [vmem:[%s387_s1 + $0xd0] sm:$0xff] }
   0x5   :  { %69 = vmatpush.msra.mxu1 %v46_v3  ;;  %v25_v12 = vld [vmem:[%s387_s1 + $0x48] sm:$0xff]  ;;  %v24_v14 = vld [vmem:[%s387_s1 + $0x40] sm:$0xff]  ;;  %v23_v16 = vld [vmem:[%s387_s1 + $0x38] sm:$0xff] }
   0x6   :  { %50 = vmatpush.msra.mxu0 %v29_v4  ;;  %v41_v13 = vld [vmem:[%s387_s1 + $0xc8] sm:$0xff]  ;;  %v40_v15 = vld [vmem:[%s387_s1 + $0xc0] sm:$0xff]  ;;  %v39_v17 = vld [vmem:[%s387_s1 + $0xb8] sm:$0xff] }
   0x7   :  { %70 = vmatpush.msra.mxu1 %v45_v5  ;;  %v22_v18 = vld [vmem:[%s387_s1 + $0x30] sm:$0xff]  ;;  %v21_v20 = vld [vmem:[%s387_s1 + $0x28] sm:$0xff]  ;;  %v20_v22 = vld [vmem:[%s387_s1 + $0x20] sm:$0xff]  ;;  %v223_v35 = vpop.eup %222 }
   0x8   :  { %51 = vmatpush.msra.mxu0 %v28_v6  ;;  %v38_v19 = vld [vmem:[%s387_s1 + $0xb0] sm:$0xff]  ;;  %v37_v21 = vld [vmem:[%s387_s1 + $0xa8] sm:$0xff]  ;;  %v36_v23 = vld [vmem:[%s387_s1 + $0xa0] sm:$0xff]  ;;  %v97_v36 = vmul.f32 8.0, %v223_v35  ;;  %vm101_vm1 = vweird.f32 %v223_v35 }
   0x9   :  { %71 = vmatpush.msra.mxu1 %v44_v7  ;;  %v19_v24 = vld [vmem:[%s387_s1 + $0x18] sm:$0xff]  ;;  %v18_v26 = vld [vmem:[%s387_s1 + $0x10] sm:$0xff]  ;;  %v17_v28 = vld [vmem:[%s387_s1 + $0x8] sm:$0xff] }
   0xa   :  { %52 = vmatpush.msra.mxu0 %v27_v8  ;;  %v35_v25 = vld [vmem:[%s387_s1 + $0x98] sm:$0xff]  ;;  %v34_v27 = vld [vmem:[%s387_s1 + $0x90] sm:$0xff]  ;;  %v33_v29 = vld [vmem:[%s387_s1 + $0x88] sm:$0xff]  ;;  %v98_v40 = vsub.f32 1.0, %v97_v36 }
   0xb   :  { %72 = vmatpush.msra.mxu1 %v43_v9  ;;  %v16_v30 = vld [vmem:[%s387_s1] sm:$0xff]  ;;  %v15_v33 = vld [vmem:[%s388_s0 + $0x8] sm:$0xff]  ;;  %v129_v42 = vld [vmem:[%s389_s2 + $0x18] sm:$0xff] }
   0xc   :  { %53 = vmatpush.msra.mxu0 %v26_v10  ;;  %v32_v31 = vld [vmem:[%s387_s1 + $0x80] sm:$0xff]  ;;  %v128_v43 = vld [vmem:[%s389_s2 + $0x10] sm:$0xff]  ;;  %145 = vmatpush.msra.mxu2 %v129_v42  ;;  %v99_v45 = vmul.f32 %v223_v35, %v98_v40  ;;  %v127_v46 = vld [vmem:[%s389_s2 + $0x8] sm:$0xff] }
   0xd   :  { %73 = vmatpush.msra.mxu1 %v42_v11  ;;  %v14_v32 = vld [vmem:[%s388_s0] sm:$0xff] }
   0xe   :  { %54 = vmatpush.msra.mxu0 %v25_v12  ;;  %146 = vmatpush.msra.mxu2 %v128_v43  ;;  %v126_v48 = vld [vmem:[%s389_s2] sm:$0xff]  ;;  %v100_v50 = vadd.f32 %v223_v35, %v99_v45 }
   0xf   :  { %74 = vmatpush.msra.mxu1 %v41_v13  ;;  %v221_v43 = vld [vmem:[%s389_s2 + $0x40] ss:$0 sm:$0xff] }
  0x10   :  { %55 = vmatpush.msra.mxu0 %v24_v14  ;;  %147 = vmatpush.msra.mxu2 %v127_v46  ;;  %v102_v53 = vsel %vm101_vm1, %v223_v35, %v100_v50 }
  0x11   :  { %75 = vmatpush.msra.mxu1 %v40_v15 }
  0x12   :  { %56 = vmatpush.msra.mxu0 %v23_v16  ;;  %148 = vmatpush.msra.mxu2 %v126_v48 }
  0x13   :  { %76 = vmatpush.msra.mxu1 %v39_v17 }
  0x14   :  { %57 = vmatpush.msra.mxu0 %v22_v18 }
  0x15   :  { %77 = vmatpush.msra.mxu1 %v38_v19 }
  0x16   :  { %58 = vmatpush.msra.mxu0 %v21_v20 }
  0x17   :  { %78 = vmatpush.msra.mxu1 %v37_v21  ;;  %v186_v21 = vld [vmem:[%s389_s2 + $0x38] sm:$0xff] }
  0x18   :  { %59 = vmatpush.msra.mxu0 %v20_v22  ;;  %204 = vmatpush.msra.mxu3 %v186_v21 }
  0x19   :  { %79 = vmatpush.msra.mxu1 %v36_v23  ;;  %v185_v23 = vld [vmem:[%s389_s2 + $0x30] sm:$0xff] }
  0x1a   :  { %60 = vmatpush.msra.mxu0 %v19_v24  ;;  %205 = vmatpush.msra.mxu3 %v185_v23 }
  0x1b   :  { %80 = vmatpush.msra.mxu1 %v35_v25 }
  0x1c   :  { %61 = vmatpush.msra.mxu0 %v18_v26  ;;  %v184_v26 = vld [vmem:[%s389_s2 + $0x28] sm:$0xff] }
  0x1d   :  { %81 = vmatpush.msra.mxu1 %v34_v27  ;;  %206 = vmatpush.msra.mxu3 %v184_v26 }
  0x1e   :  { %62 = vmatpush.msra.mxu0 %v17_v28  ;;  %v183_v28 = vld [vmem:[%s389_s2 + $0x20] sm:$0xff] }
  0x1f   :  { %82 = vmatpush.msra.mxu1 %v33_v29  ;;  %207 = vmatpush.msra.mxu3 %v183_v28 }
  0x20   :  { %63 = vmatpush.msra.mxu0 %v16_v30 }
  0x21   :  { %83 = vmatpush.msra.mxu1 %v32_v31  ;;  %64 = vmatmul.f32.vlgmr.msra.gmra.mxu0 %v14_v32 }
  0x22   :  { %84 = vmatmul.f32.vlgmr.msra.gmra.mxu1 %v15_v33 }
  0x9e   :  { %v65_v37 = vpop.f32.mrf.mxu0 }
  0x9f   :  { %v85_v38 = vpop.f32.mrf.mxu1 }
  0xa0   :  { %v86_v39 = vadd.f32 %v85_v38, %v65_v37 }
  0xa2   :  { %v89_v41 = vsel %vm88_vm0, %v86_v39, 0.0 }
  0xa3   :  { %v90_v44 = vrot.slane %v89_v41, 4 }
  0xa5   :  { %v91_v47 = vadd.f32 %v90_v44, %v89_v41 }
  0xa7   :  { %v92_v49 = vrot.slane %v91_v47, 2 }
  0xa9   :  { %v93_v51 = vadd.f32 %v92_v49, %v91_v47 }
  0xab   :  { %v94_v52 = vrot.slane %v93_v51, 1 }
  0xad   :  { %v95_v54 = vadd.f32 %v94_v52, %v93_v51 }
  0xaf   :  { %v103_v55 = vmul.f32 %v102_v53, %v95_v54 }
  0xb1   :  { %v104_v56 = vsub.f32 %v86_v39, %v103_v55 }
  0xb3   :  { %v105_v57 = vmul.f32 %v104_v56, %v104_v56 }
  0xb5   :  { %v106_v58 = vsel %vm88_vm0, %v105_v57, 0.0 }
  0xb6   :  { %v107_v59 = vrot.slane %v106_v58, 4 }
  0xb8   :  { %v108_v60 = vadd.f32 %v107_v59, %v106_v58 }
  0xba   :  { %v109_v61 = vrot.slane %v108_v60, 2 }
  0xbc   :  { %v110_v62 = vadd.f32 %v109_v61, %v108_v60 }
  0xbe   :  { %v111_v63 = vrot.slane %v110_v62, 1 }
  0xc0   :  { %v112_v0 = vadd.f32 %v111_v63, %v110_v62 }
  0xc2   :  { %v113_v1 = vmul.f32 %v112_v0, %v102_v53 }
  0xc4   :  { %v114_v2 = vadd.f32 1e-05, %v113_v1 }
  0xc6   :  { %224 = vrsqrt.f32 %v114_v2  ;;  %vm121_vm3 = vweird.f32 %v114_v2 }
  0xcc   :  { %v225_v3 = vpop.eup %224 }
  0xcd   :  { %v116_v4 = vmul.f32 %v225_v3, %v114_v2  ;;  %vm122_vm2 = vweird.f32 %v225_v3 }
  0xce   :  { %vm123_vm4 = vmor %vm121_vm3, %vm122_vm2 }
  0xcf   :  { %v117_v5 = vmul.f32 %v225_v3, %v116_v4 }
  0xd1   :  { %v118_v6 = vmul.f32 0.5, %v117_v5 }
  0xd3   :  { %v119_v7 = vsub.f32 1.5, %v118_v6 }
  0xd5   :  { %v120_v8 = vmul.f32 %v225_v3, %v119_v7 }
  0xd7   :  { %v124_v9 = vsel %vm123_vm4, %v225_v3, %v120_v8 }
  0xd8   :  { %v125_v10 = vmul.f32 %v124_v9, %v104_v56 }
  0xda   :  { %218 = vmatmul.msk.f32.vlgmr.msra.gmra.mxu2 %vm88_vm0, %v125_v10 }
 0x15d   :  { %v150_v11 = vpop.f32.mrf.mxu2 }
 0x15e   :  { %v153_v12 = vsel %vm88_vm0, %v150_v11, 0.0 }
 0x15f   :  { %v154_v13 = vrot.slane %v153_v12, 4 }
 0x161   :  { %v155_v14 = vadd.f32 %v154_v13, %v153_v12 }
 0x163   :  { %v156_v15 = vrot.slane %v155_v14, 2 }
 0x165   :  { %v157_v16 = vadd.f32 %v156_v15, %v155_v14 }
 0x167   :  { %v158_v17 = vrot.slane %v157_v16, 1 }
 0x169   :  { %v159_v18 = vadd.f32 %v158_v17, %v157_v16 }
 0x16b   :  { %v160_v19 = vmul.f32 %v159_v18, %v102_v53 }
 0x16d   :  { %v161_v20 = vsub.f32 %v150_v11, %v160_v19 }
 0x16f   :  { %v162_v22 = vmul.f32 %v161_v20, %v161_v20 }
 0x171   :  { %v163_v24 = vsel %vm88_vm0, %v162_v22, 0.0 }
 0x172   :  { %v164_v25 = vrot.slane %v163_v24, 4 }
 0x174   :  { %v165_v27 = vadd.f32 %v164_v25, %v163_v24 }
 0x176   :  { %v166_v29 = vrot.slane %v165_v27, 2 }
 0x178   :  { %v167_v30 = vadd.f32 %v166_v29, %v165_v27 }
 0x17a   :  { %v168_v31 = vrot.slane %v167_v30, 1 }
 0x17c   :  { %v169_v32 = vadd.f32 %v168_v31, %v167_v30 }
 0x17e   :  { %v170_v33 = vmul.f32 %v169_v32, %v102_v53 }
 0x180   :  { %v171_v34 = vadd.f32 1e-05, %v170_v33 }
 0x182   :  { %226 = vrsqrt.f32 %v171_v34  ;;  %vm178_vm6 = vweird.f32 %v171_v34 }
 0x188   :  { %v227_v35 = vpop.eup %226 }
 0x189   :  { %v173_v36 = vmul.f32 %v227_v35, %v171_v34  ;;  %vm179_vm5 = vweird.f32 %v227_v35 }
 0x18a   :  { %vm180_vm7 = vmor %vm178_vm6, %vm179_vm5 }
 0x18b   :  { %v174_v37 = vmul.f32 %v227_v35, %v173_v36 }
 0x18d   :  { %v175_v38 = vmul.f32 0.5, %v174_v37 }
 0x18f   :  { %v176_v39 = vsub.f32 1.5, %v175_v38 }
 0x191   :  { %v177_v40 = vmul.f32 %v227_v35, %v176_v39 }
 0x193   :  { %v181_v41 = vsel %vm180_vm7, %v227_v35, %v177_v40 }
 0x194   :  { %v182_v42 = vmul.f32 %v181_v41, %v161_v20 }
 0x196   :  { %219 = vmatmul.msk.f32.vlgmr.msra.gmra.mxu3 %vm88_vm0, %v182_v42 }
 0x219   :  { %v209_v44 = vpop.f32.mrf.mxu3 }
 0x21a   :  { %v210_v45 = vadd.f32 %v221_v43, %v209_v44 }
 0x21c   :  { %213 = vst.msk [vmem:[%s390_s3] sm:$0xff] %vm212_vm8, %v210_v45 }

</bundles_post_ra>
